<compile_context>
chip_gen: v6e
topology: v6e:2x2x1
jax: 0.10.0
libtpu: 0.0.40
codegen_flags: <defaults>
</compile_context>

<pallas_src>
import functools

import jax
import jax.numpy as jnp
from jax.experimental import pallas as pl
from jax.experimental.pallas import tpu as pltpu


# ----------------------------------------------------------------------------
# Fused kernel: Bc images per grid step, everything resident in VMEM.
# ----------------------------------------------------------------------------
def _hgnet_fused_kernel(x_ref, m_ref, wc_ref, wa_ref, we_ref, b_ref,
                        p_ref, pb_ref, o_ref, stk_ref,
                        *, H, W, cin_pad, mid, out_chs, bc):
    HW = H * W
    N = bc * HW
    x = x_ref[0]                                           # (cin_pad, N)

    # 3x3 tap shifts over the flat, batch-folded lane axis. Rolls that wrap
    # across image (or fold) boundaries are zeroed by the precomputed masks.
    shifts = [(-(dy * W + dx)) % N for dy in (-1, 0, 1) for dx in (-1, 0, 1)]

    def conv3x3_bn_relu(xin, wslab, bias):
        # im2col: 9 rolled+masked views -> (9*cin_pad, N) scratch, ONE matmul.
        for t, sh in enumerate(shifts):
            lo = t * cin_pad
            if sh == 0:                                    # center tap: always valid
                stk_ref[lo:lo + cin_pad, :] = xin
            else:
                stk_ref[lo:lo + cin_pad, :] = pltpu.roll(xin, sh, 1) * m_ref[t]
        h = jnp.dot(wslab, stk_ref[...], preferred_element_type=jnp.float32)
        return jnp.maximum(h + bias, 0.0)                  # folded-BN bias + ReLU

    h1 = conv3x3_bn_relu(x, wc_ref[0], b_ref[0])           # (mid, N)
    h2 = conv3x3_bn_relu(h1, wc_ref[1], b_ref[1])          # (mid, N)

    # 1x1 aggregation conv over concat([x, h1, h2]) as ONE matmul: reuse the
    # im2col scratch's first rows as the concatenated activation slab.
    tot = cin_pad + 2 * mid
    stk_ref[0:cin_pad, :] = x
    stk_ref[cin_pad:cin_pad + mid, :] = h1
    stk_ref[cin_pad + mid:tot, :] = h2
    agg = jnp.dot(wa_ref[...], stk_ref[0:tot, :],
                  preferred_element_type=jnp.float32)
    agg = jnp.maximum(agg + b_ref[2], 0.0)                 # (out_chs, N)

    # ESE: per-image global mean (pooling matmul keeps it correct when several
    # images share the lane axis), 1x1 conv + bias, sigmoid, broadcast gate.
    pooled = jnp.dot(agg, p_ref[...], preferred_element_type=jnp.float32)   # (out, bc)
    s = jnp.dot(we_ref[...], pooled, preferred_element_type=jnp.float32) + b_ref[3]
    gate = jnp.dot(jax.nn.sigmoid(s), pb_ref[...],
                   preferred_element_type=jnp.float32)     # (out, N)

    # TODO(synk): residual / DropPath branch not exercised (residual=False,
    # drop_path=0.0 in this configuration).
    o_ref[0] = agg * gate


# ----------------------------------------------------------------------------
# Host-side helpers (grid choice, masks, pooling matrices)
# ----------------------------------------------------------------------------
def _choose_grid(B, HW, target_lanes=4096, min_steps=2):
    """Smallest #steps >= min_steps (megacore) that keeps lanes/step <= target."""
    for g in range(1, B + 1):
        if B % g == 0 and g >= min(min_steps, B) and (B // g) * HW <= target_lanes:
            return g
    return B


def _make_masks(H, W, bc, cin_pad):
    """Per-tap validity masks, pre-broadcast to sublane height: (9, cin_pad, N)."""
    N = bc * H * W
    n = jnp.arange(N)
    col = n % W
    row = (n // W) % H                      # row within each folded image
    rows = []
    for dy in (-1, 0, 1):
        for dx in (-1, 0, 1):
            ok = jnp.ones((N,), dtype=bool)
            if dy == -1:
                ok = ok & (row > 0)
            elif dy == 1:
                ok = ok & (row < H - 1)
            if dx == -1:
                ok = ok & (col > 0)
            elif dx == 1:
                ok = ok & (col < W - 1)
            rows.append(ok)
    m = jnp.stack(rows, axis=0).astype(jnp.float32)          # (9, N)
    return jnp.broadcast_to(m[:, None, :], (9, cin_pad, N))


def _make_pool_mats(H, W, bc):
    """P: (N, bc) block-averaging matrix; Pb: (bc, N) per-image broadcast matrix."""
    HW = H * W
    N = bc * HW
    img = jnp.arange(N) // HW
    onehot = (img[:, None] == jnp.arange(bc)[None, :]).astype(jnp.float32)
    return onehot / HW, jnp.transpose(onehot)


# ----------------------------------------------------------------------------
# Wrapper
# ----------------------------------------------------------------------------
def hgnet_block_forward(x_nchw, kp, *, target_lanes=4096, min_steps=2):
    """x_nchw: (B, Cin, H, W) float32; kp: prepared kernel params."""
    B, Cin, H, W = x_nchw.shape
    HW = H * W
    cin_pad, mid, out_chs = kp["cin_pad"], kp["mid_chs"], kp["out_chs"]

    G = _choose_grid(B, HW, target_lanes, min_steps)
    Bc = B // G
    N = Bc * HW

    # Fold batch into lanes: (B, Cin, HW) -> pad channels -> (G, cin_pad, Bc*HW)
    xf = x_nchw.reshape(B, Cin, HW)
    if Cin < cin_pad:
        xf = jnp.pad(xf, ((0, 0), (0, cin_pad - Cin), (0, 0)))
    xf = xf.reshape(G, Bc, cin_pad, HW).transpose(0, 2, 1, 3).reshape(G, cin_pad, N)

    masks = _make_masks(H, W, Bc, cin_pad)     # (9, cin_pad, N)
    P, Pb = _make_pool_mats(H, W, Bc)          # (N, Bc), (Bc, N)

    def rep(a):                                # replicated (full-array) block
        return pl.BlockSpec(a.shape, lambda g, _n=a.ndim: (0,) * _n)

    kern = functools.partial(_hgnet_fused_kernel, H=H, W=W, cin_pad=cin_pad,
                             mid=mid, out_chs=out_chs, bc=Bc)
    y = pl.pallas_call(
        kern,
        out_shape=jax.ShapeDtypeStruct((G, out_chs, N), jnp.float32),
        grid=(G,),
        in_specs=[
            pl.BlockSpec((1, cin_pad, N), lambda g: (g, 0, 0)),   # x
            rep(masks),                                           # masks
            rep(kp["wconv"]),                                     # (2, mid, 9*cin_pad)
            rep(kp["wa"]),                                        # (out, cin_pad+2*mid)
            rep(kp["we"]),                                        # (out, out)
            rep(kp["bias"]),                                      # (4, C, 1)
            rep(P), rep(Pb),
        ],
        out_specs=pl.BlockSpec((1, out_chs, N), lambda g: (g, 0, 0)),
        scratch_shapes=[pltpu.VMEM((9 * cin_pad, N), jnp.float32)],
        compiler_params=pltpu.CompilerParams(
            dimension_semantics=("parallel",)),                   # steps over 2 TCs on v7x
    )(xf, masks, kp["wconv"], kp["wa"], kp["we"], kp["bias"], P, Pb)

    return (y.reshape(G, out_chs, Bc, HW)
             .transpose(0, 2, 1, 3)
             .reshape(B, out_chs, H, W))


# ----------------------------------------------------------------------------
# Parameter construction (deterministic, synthetic) + BN folding into weights
# ----------------------------------------------------------------------------
def fold_bn(gamma, beta, mean, var, eps=1e-5):
    scale = gamma / jnp.sqrt(var + eps)
    bias = beta - mean * scale
    return scale, bias


def make_params(key, in_chs, mid_chs, out_chs, layer_num):
    keys = jax.random.split(key, 32)
    ki = iter(range(32))

    def bn_params(c):
        gamma = 0.5 + jax.random.uniform(keys[next(ki)], (c,))
        beta = 0.1 * jax.random.normal(keys[next(ki)], (c,))
        mean = 0.1 * jax.random.normal(keys[next(ki)], (c,))
        var = 0.5 + jax.random.uniform(keys[next(ki)], (c,))
        return fold_bn(gamma, beta, mean, var)

    params = {"layers": []}
    cin = in_chs
    for _ in range(layer_num):
        w = 0.1 * jax.random.normal(keys[next(ki)], (3, 3, cin, mid_chs))  # HWIO
        s, b = bn_params(mid_chs)
        params["layers"].append((w.astype(jnp.float32), s, b))
        cin = mid_chs

    total = in_chs + layer_num * mid_chs
    params["agg_w"] = (0.1 * jax.random.normal(
        keys[next(ki)], (total, out_chs))).astype(jnp.float32)
    params["agg_scale"], params["agg_bias"] = bn_params(out_chs)
    params["ese_w"] = (0.1 * jax.random.normal(
        keys[next(ki)], (out_chs, out_chs))).astype(jnp.float32)
    params["ese_b"] = (0.1 * jax.random.normal(
        keys[next(ki)], (out_chs,))).astype(jnp.float32)
    return params


def prepare_kernel_params(params, in_chs, mid_chs, out_chs):
    """Fold BN into weights; build (Cout, 9*Cin) conv slabs and coalesced operands."""
    assert mid_chs % 8 == 0 and in_chs <= mid_chs and mid_chs == out_chs, \
        "kernel instantiated for the in<=mid==out, mid%8==0 configuration"
    cin_pad = mid_chs
    (w1, s1, b1), (w2, s2, b2) = params["layers"]

    def conv_slab(w, s):   # (3,3,Cin,Cout) HWIO * BN scale -> (Cout, 9*cin_pad)
        wf = w * s[None, None, None, :]
        wf = jnp.transpose(wf, (3, 0, 1, 2))               # (Cout, 3, 3, Cin)
        cin = wf.shape[-1]
        if cin < cin_pad:
            wf = jnp.pad(wf, ((0, 0), (0, 0), (0, 0), (0, cin_pad - cin)))
        return wf.reshape(wf.shape[0], 9 * cin_pad)

    wconv = jnp.stack([conv_slab(w1, s1), conv_slab(w2, s2)], axis=0)

    wa = (params["agg_w"] * params["agg_scale"][None, :]).T          # (out, total)
    wa0 = jnp.pad(wa[:, :in_chs], ((0, 0), (0, cin_pad - in_chs)))   # (out, cin_pad)
    wa = jnp.concatenate([wa0, wa[:, in_chs:]], axis=1)              # (out, cin_pad+2*mid)
    we = params["ese_w"].T                                           # (out, out)
    bias = jnp.stack([b1, b2, params["agg_bias"], params["ese_b"]],
                     axis=0)[:, :, None]                             # (4, C, 1)

    return {"wconv": wconv, "wa": wa, "we": we, "bias": bias,
            "cin_pad": cin_pad, "mid_chs": mid_chs, "out_chs": out_chs}


# ----------------------------------------------------------------------------
# Pure-JAX reference (for correctness check), NCHW in/out
# ----------------------------------------------------------------------------
def _ref_forward(x_nchw, params):
    x = jnp.transpose(x_nchw, (0, 2, 3, 1))                    # NHWC
    dn = jax.lax.conv_dimension_numbers(x.shape, (3, 3, 1, 1),
                                        ("NHWC", "HWIO", "NHWC"))
    outs = [x]
    h = x
    for (w, s, b) in params["layers"]:
        y = jax.lax.conv_general_dilated(h, w, (1, 1), "SAME",
                                         dimension_numbers=dn)
        h = jnp.maximum(y * s + b, 0.0)
        outs.append(h)
    cat = jnp.concatenate(outs, axis=-1)
    agg = jnp.maximum(
        jnp.einsum("bhwc,cd->bhwd", cat, params["agg_w"])
        * params["agg_scale"] + params["agg_bias"], 0.0)
    m = agg.mean(axis=(1, 2), keepdims=True)
    g = jax.nn.sigmoid(jnp.einsum("bhwc,cd->bhwd", m, params["ese_w"])
                       + params["ese_b"])
    return jnp.transpose(agg * g, (0, 3, 1, 2))                # NCHW


if __name__ == "__main__":
    B, in_chs, H, W = 2, 4, 16, 16
    mid_chs, out_chs, layer_num = 8, 8, 2

    key = jax.random.PRNGKey(0)
    k_x, k_p = jax.random.split(key)
    x_nchw = jax.random.normal(k_x, (B, in_chs, H, W), dtype=jnp.float32)
    params = make_params(k_p, in_chs, mid_chs, out_chs, layer_num)
    kp = prepare_kernel_params(params, in_chs, mid_chs, out_chs)

    out = hgnet_block_forward(x_nchw, kp)      # NCHW in -> NCHW out
    jax.block_until_ready(out)

    ref = _ref_forward(x_nchw, params)
    assert out.shape == (B, out_chs, H, W)
    assert jnp.allclose(out, ref, rtol=1e-4, atol=1e-4), "mismatch vs reference"

    print("KERNEL_OK")
</pallas_src>

<mosaic_0001>
module attributes {stable_mosaic.version = 11 : i64} {
  func.func @_hgnet_fused_kernel(%arg0: i32, %arg1: memref<1x8x256xf32, #tpu.memory_space<vmem>>, %arg2: memref<9x8x256xf32, #tpu.memory_space<vmem>>, %arg3: memref<2x8x72xf32, #tpu.memory_space<vmem>>, %arg4: memref<8x24xf32, #tpu.memory_space<vmem>>, %arg5: memref<8x8xf32, #tpu.memory_space<vmem>>, %arg6: memref<4x8x1xf32, #tpu.memory_space<vmem>>, %arg7: memref<256x1xf32, #tpu.memory_space<vmem>>, %arg8: memref<1x256xf32, #tpu.memory_space<vmem>>, %arg9: memref<1x8x256xf32, #tpu.memory_space<vmem>>, %arg10: memref<72x256xf32, #tpu.memory_space<vmem>>) attributes {dimension_semantics = [#tpu.dimension_semantics<parallel>], iteration_bounds = array<i64: 2>, scalar_prefetch = 0 : i64, scratch_operands = 1 : i64, tpu.core_type = #tpu.core_type<tc>, window_params = [{transform_indices = @transform_0, window_bounds = array<i64: 1, 8, 256>}, {pipeline_mode = #tpu.pipeline_mode<synchronous>, transform_indices = @transform_1, window_bounds = array<i64: 9, 8, 256>}, {pipeline_mode = #tpu.pipeline_mode<synchronous>, transform_indices = @transform_2, window_bounds = array<i64: 2, 8, 72>}, {pipeline_mode = #tpu.pipeline_mode<synchronous>, transform_indices = @transform_3, window_bounds = array<i64: 8, 24>}, {pipeline_mode = #tpu.pipeline_mode<synchronous>, transform_indices = @transform_4, window_bounds = array<i64: 8, 8>}, {pipeline_mode = #tpu.pipeline_mode<synchronous>, transform_indices = @transform_5, window_bounds = array<i64: 4, 8, 1>}, {pipeline_mode = #tpu.pipeline_mode<synchronous>, transform_indices = @transform_6, window_bounds = array<i64: 256, 1>}, {pipeline_mode = #tpu.pipeline_mode<synchronous>, transform_indices = @transform_7, window_bounds = array<i64: 1, 256>}, {transform_indices = @transform_8, window_bounds = array<i64: 1, 8, 256>}]} {
    %c0 = arith.constant 0 : index
    %c0_0 = arith.constant 0 : index
    %c0_1 = arith.constant 0 : index
    %0 = vector.load %arg1[%c0, %c0_0, %c0_1] : memref<1x8x256xf32, #tpu.memory_space<vmem>>, vector<1x8x256xf32>
    %1 = vector.shape_cast %0 : vector<1x8x256xf32> to vector<8x256xf32>
    %c0_2 = arith.constant 0 : index
    %c0_3 = arith.constant 0 : index
    %c0_4 = arith.constant 0 : index
    %2 = vector.load %arg3[%c0_2, %c0_3, %c0_4] : memref<2x8x72xf32, #tpu.memory_space<vmem>>, vector<1x8x72xf32>
    %3 = vector.shape_cast %2 : vector<1x8x72xf32> to vector<8x72xf32>
    %c0_5 = arith.constant 0 : index
    %c0_6 = arith.constant 0 : index
    %c0_7 = arith.constant 0 : index
    %4 = vector.load %arg6[%c0_5, %c0_6, %c0_7] : memref<4x8x1xf32, #tpu.memory_space<vmem>>, vector<1x8x1xf32>
    %5 = vector.shape_cast %4 : vector<1x8x1xf32> to vector<8x1xf32>
    %c17_i32 = arith.constant 17 : i32
    %6 = tpu.dynamic_rotate %1 by %c17_i32 dim 1 : vector<8x256xf32>, i32 -> vector<8x256xf32>
    %c0_8 = arith.constant 0 : index
    %c0_9 = arith.constant 0 : index
    %c0_10 = arith.constant 0 : index
    %7 = vector.load %arg2[%c0_8, %c0_9, %c0_10] : memref<9x8x256xf32, #tpu.memory_space<vmem>>, vector<1x8x256xf32>
    %8 = vector.shape_cast %7 : vector<1x8x256xf32> to vector<8x256xf32>
    %9 = arith.mulf %6, %8 : vector<8x256xf32>
    %c0_11 = arith.constant 0 : index
    %c0_12 = arith.constant 0 : index
    %10 = vector.load %arg10[%c0_11, %c0_12] : memref<72x256xf32, #tpu.memory_space<vmem>>, vector<8x256xf32>
    tpu.vector_store %arg10[%c0_11, %c0_12], %9 {strides = array<i32>} : memref<72x256xf32, #tpu.memory_space<vmem>>, vector<8x256xf32>,
    %c16_i32 = arith.constant 16 : i32
    %11 = tpu.dynamic_rotate %1 by %c16_i32 dim 1 : vector<8x256xf32>, i32 -> vector<8x256xf32>
    %c1 = arith.constant 1 : index
    %c0_13 = arith.constant 0 : index
    %c0_14 = arith.constant 0 : index
    %12 = vector.load %arg2[%c1, %c0_13, %c0_14] : memref<9x8x256xf32, #tpu.memory_space<vmem>>, vector<1x8x256xf32>
    %13 = vector.shape_cast %12 : vector<1x8x256xf32> to vector<8x256xf32>
    %14 = arith.mulf %11, %13 : vector<8x256xf32>
    %c8 = arith.constant 8 : index
    %c0_15 = arith.constant 0 : index
    %15 = vector.load %arg10[%c8, %c0_15] : memref<72x256xf32, #tpu.memory_space<vmem>>, vector<8x256xf32>
    tpu.vector_store %arg10[%c8, %c0_15], %14 {strides = array<i32>} : memref<72x256xf32, #tpu.memory_space<vmem>>, vector<8x256xf32>,
    %c15_i32 = arith.constant 15 : i32
    %16 = tpu.dynamic_rotate %1 by %c15_i32 dim 1 : vector<8x256xf32>, i32 -> vector<8x256xf32>
    %c2 = arith.constant 2 : index
    %c0_16 = arith.constant 0 : index
    %c0_17 = arith.constant 0 : index
    %17 = vector.load %arg2[%c2, %c0_16, %c0_17] : memref<9x8x256xf32, #tpu.memory_space<vmem>>, vector<1x8x256xf32>
    %18 = vector.shape_cast %17 : vector<1x8x256xf32> to vector<8x256xf32>
    %19 = arith.mulf %16, %18 : vector<8x256xf32>
    %c16 = arith.constant 16 : index
    %c0_18 = arith.constant 0 : index
    %20 = vector.load %arg10[%c16, %c0_18] : memref<72x256xf32, #tpu.memory_space<vmem>>, vector<8x256xf32>
    tpu.vector_store %arg10[%c16, %c0_18], %19 {strides = array<i32>} : memref<72x256xf32, #tpu.memory_space<vmem>>, vector<8x256xf32>,
    %c1_i32 = arith.constant 1 : i32
    %21 = tpu.dynamic_rotate %1 by %c1_i32 dim 1 : vector<8x256xf32>, i32 -> vector<8x256xf32>
    %c3 = arith.constant 3 : index
    %c0_19 = arith.constant 0 : index
    %c0_20 = arith.constant 0 : index
    %22 = vector.load %arg2[%c3, %c0_19, %c0_20] : memref<9x8x256xf32, #tpu.memory_space<vmem>>, vector<1x8x256xf32>
    %23 = vector.shape_cast %22 : vector<1x8x256xf32> to vector<8x256xf32>
    %24 = arith.mulf %21, %23 : vector<8x256xf32>
    %c24 = arith.constant 24 : index
    %c0_21 = arith.constant 0 : index
    %25 = vector.load %arg10[%c24, %c0_21] : memref<72x256xf32, #tpu.memory_space<vmem>>, vector<8x256xf32>
    tpu.vector_store %arg10[%c24, %c0_21], %24 {strides = array<i32>} : memref<72x256xf32, #tpu.memory_space<vmem>>, vector<8x256xf32>,
    %c32 = arith.constant 32 : index
    %c0_22 = arith.constant 0 : index
    %26 = vector.load %arg10[%c32, %c0_22] : memref<72x256xf32, #tpu.memory_space<vmem>>, vector<8x256xf32>
    tpu.vector_store %arg10[%c32, %c0_22], %1 {strides = array<i32>} : memref<72x256xf32, #tpu.memory_space<vmem>>, vector<8x256xf32>,
    %c255_i32 = arith.constant 255 : i32
    %27 = tpu.dynamic_rotate %1 by %c255_i32 dim 1 : vector<8x256xf32>, i32 -> vector<8x256xf32>
    %c5 = arith.constant 5 : index
    %c0_23 = arith.constant 0 : index
    %c0_24 = arith.constant 0 : index
    %28 = vector.load %arg2[%c5, %c0_23, %c0_24] : memref<9x8x256xf32, #tpu.memory_space<vmem>>, vector<1x8x256xf32>
    %29 = vector.shape_cast %28 : vector<1x8x256xf32> to vector<8x256xf32>
    %30 = arith.mulf %27, %29 : vector<8x256xf32>
    %c40 = arith.constant 40 : index
    %c0_25 = arith.constant 0 : index
    %31 = vector.load %arg10[%c40, %c0_25] : memref<72x256xf32, #tpu.memory_space<vmem>>, vector<8x256xf32>
    tpu.vector_store %arg10[%c40, %c0_25], %30 {strides = array<i32>} : memref<72x256xf32, #tpu.memory_space<vmem>>, vector<8x256xf32>,
    %c241_i32 = arith.constant 241 : i32
    %32 = tpu.dynamic_rotate %1 by %c241_i32 dim 1 : vector<8x256xf32>, i32 -> vector<8x256xf32>
    %c6 = arith.constant 6 : index
    %c0_26 = arith.constant 0 : index
    %c0_27 = arith.constant 0 : index
    %33 = vector.load %arg2[%c6, %c0_26, %c0_27] : memref<9x8x256xf32, #tpu.memory_space<vmem>>, vector<1x8x256xf32>
    %34 = vector.shape_cast %33 : vector<1x8x256xf32> to vector<8x256xf32>
    %35 = arith.mulf %32, %34 : vector<8x256xf32>
    %c48 = arith.constant 48 : index
    %c0_28 = arith.constant 0 : index
    %36 = vector.load %arg10[%c48, %c0_28] : memref<72x256xf32, #tpu.memory_space<vmem>>, vector<8x256xf32>
    tpu.vector_store %arg10[%c48, %c0_28], %35 {strides = array<i32>} : memref<72x256xf32, #tpu.memory_space<vmem>>, vector<8x256xf32>,
    %c240_i32 = arith.constant 240 : i32
    %37 = tpu.dynamic_rotate %1 by %c240_i32 dim 1 : vector<8x256xf32>, i32 -> vector<8x256xf32>
    %c7 = arith.constant 7 : index
    %c0_29 = arith.constant 0 : index
    %c0_30 = arith.constant 0 : index
    %38 = vector.load %arg2[%c7, %c0_29, %c0_30] : memref<9x8x256xf32, #tpu.memory_space<vmem>>, vector<1x8x256xf32>
    %39 = vector.shape_cast %38 : vector<1x8x256xf32> to vector<8x256xf32>
    %40 = arith.mulf %37, %39 : vector<8x256xf32>
    %c56 = arith.constant 56 : index
    %c0_31 = arith.constant 0 : index
    %41 = vector.load %arg10[%c56, %c0_31] : memref<72x256xf32, #tpu.memory_space<vmem>>, vector<8x256xf32>
    tpu.vector_store %arg10[%c56, %c0_31], %40 {strides = array<i32>} : memref<72x256xf32, #tpu.memory_space<vmem>>, vector<8x256xf32>,
    %c239_i32 = arith.constant 239 : i32
    %42 = tpu.dynamic_rotate %1 by %c239_i32 dim 1 : vector<8x256xf32>, i32 -> vector<8x256xf32>
    %c8_32 = arith.constant 8 : index
    %c0_33 = arith.constant 0 : index
    %c0_34 = arith.constant 0 : index
    %43 = vector.load %arg2[%c8_32, %c0_33, %c0_34] : memref<9x8x256xf32, #tpu.memory_space<vmem>>, vector<1x8x256xf32>
    %44 = vector.shape_cast %43 : vector<1x8x256xf32> to vector<8x256xf32>
    %45 = arith.mulf %42, %44 : vector<8x256xf32>
    %c64 = arith.constant 64 : index
    %c0_35 = arith.constant 0 : index
    %46 = vector.load %arg10[%c64, %c0_35] : memref<72x256xf32, #tpu.memory_space<vmem>>, vector<8x256xf32>
    tpu.vector_store %arg10[%c64, %c0_35], %45 {strides = array<i32>} : memref<72x256xf32, #tpu.memory_space<vmem>>, vector<8x256xf32>,
    %c0_36 = arith.constant 0 : index
    %c0_37 = arith.constant 0 : index
    %47 = vector.load %arg10[%c0_36, %c0_37] : memref<72x256xf32, #tpu.memory_space<vmem>>, vector<72x256xf32>
    %cst = arith.constant dense<0.000000e+00> : vector<8x256xf32>
    %48 = tpu.matmul %3, %47, %cst {dimension_numbers = #tpu.dot_dimension_numbers<[1], [0], [0], [1], [0, 0, 1, 1], [], []>} : vector<8x72xf32>, vector<72x256xf32>, vector<8x256xf32> -> vector<8x256xf32>
    %49 = vector.broadcast %5 : vector<8x1xf32> to vector<8x256xf32>
    %50 = arith.addf %48, %49 : vector<8x256xf32>
    %cst_38 = arith.constant 0.000000e+00 : f32
    %51 = vector.broadcast %cst_38 : f32 to vector<8x256xf32>
    %52 = arith.maximumf %50, %51 : vector<8x256xf32>
    %c1_39 = arith.constant 1 : index
    %c0_40 = arith.constant 0 : index
    %c0_41 = arith.constant 0 : index
    %53 = vector.load %arg3[%c1_39, %c0_40, %c0_41] : memref<2x8x72xf32, #tpu.memory_space<vmem>>, vector<1x8x72xf32>
    %54 = vector.shape_cast %53 : vector<1x8x72xf32> to vector<8x72xf32>
    %c1_42 = arith.constant 1 : index
    %c0_43 = arith.constant 0 : index
    %c0_44 = arith.constant 0 : index
    %55 = vector.load %arg6[%c1_42, %c0_43, %c0_44] : memref<4x8x1xf32, #tpu.memory_space<vmem>>, vector<1x8x1xf32>
    %56 = vector.shape_cast %55 : vector<1x8x1xf32> to vector<8x1xf32>
    %c17_i32_45 = arith.constant 17 : i32
    %57 = tpu.dynamic_rotate %52 by %c17_i32_45 dim 1 : vector<8x256xf32>, i32 -> vector<8x256xf32>
    %c0_46 = arith.constant 0 : index
    %c0_47 = arith.constant 0 : index
    %c0_48 = arith.constant 0 : index
    %58 = vector.load %arg2[%c0_46, %c0_47, %c0_48] : memref<9x8x256xf32, #tpu.memory_space<vmem>>, vector<1x8x256xf32>
    %59 = vector.shape_cast %58 : vector<1x8x256xf32> to vector<8x256xf32>
    %60 = arith.mulf %57, %59 : vector<8x256xf32>
    %c0_49 = arith.constant 0 : index
    %c0_50 = arith.constant 0 : index
    %61 = vector.load %arg10[%c0_49, %c0_50] : memref<72x256xf32, #tpu.memory_space<vmem>>, vector<8x256xf32>
    tpu.vector_store %arg10[%c0_49, %c0_50], %60 {strides = array<i32>} : memref<72x256xf32, #tpu.memory_space<vmem>>, vector<8x256xf32>,
    %c16_i32_51 = arith.constant 16 : i32
    %62 = tpu.dynamic_rotate %52 by %c16_i32_51 dim 1 : vector<8x256xf32>, i32 -> vector<8x256xf32>
    %c1_52 = arith.constant 1 : index
    %c0_53 = arith.constant 0 : index
    %c0_54 = arith.constant 0 : index
    %63 = vector.load %arg2[%c1_52, %c0_53, %c0_54] : memref<9x8x256xf32, #tpu.memory_space<vmem>>, vector<1x8x256xf32>
    %64 = vector.shape_cast %63 : vector<1x8x256xf32> to vector<8x256xf32>
    %65 = arith.mulf %62, %64 : vector<8x256xf32>
    %c8_55 = arith.constant 8 : index
    %c0_56 = arith.constant 0 : index
    %66 = vector.load %arg10[%c8_55, %c0_56] : memref<72x256xf32, #tpu.memory_space<vmem>>, vector<8x256xf32>
    tpu.vector_store %arg10[%c8_55, %c0_56], %65 {strides = array<i32>} : memref<72x256xf32, #tpu.memory_space<vmem>>, vector<8x256xf32>,
    %c15_i32_57 = arith.constant 15 : i32
    %67 = tpu.dynamic_rotate %52 by %c15_i32_57 dim 1 : vector<8x256xf32>, i32 -> vector<8x256xf32>
    %c2_58 = arith.constant 2 : index
    %c0_59 = arith.constant 0 : index
    %c0_60 = arith.constant 0 : index
    %68 = vector.load %arg2[%c2_58, %c0_59, %c0_60] : memref<9x8x256xf32, #tpu.memory_space<vmem>>, vector<1x8x256xf32>
    %69 = vector.shape_cast %68 : vector<1x8x256xf32> to vector<8x256xf32>
    %70 = arith.mulf %67, %69 : vector<8x256xf32>
    %c16_61 = arith.constant 16 : index
    %c0_62 = arith.constant 0 : index
    %71 = vector.load %arg10[%c16_61, %c0_62] : memref<72x256xf32, #tpu.memory_space<vmem>>, vector<8x256xf32>
    tpu.vector_store %arg10[%c16_61, %c0_62], %70 {strides = array<i32>} : memref<72x256xf32, #tpu.memory_space<vmem>>, vector<8x256xf32>,
    %c1_i32_63 = arith.constant 1 : i32
    %72 = tpu.dynamic_rotate %52 by %c1_i32_63 dim 1 : vector<8x256xf32>, i32 -> vector<8x256xf32>
    %c3_64 = arith.constant 3 : index
    %c0_65 = arith.constant 0 : index
    %c0_66 = arith.constant 0 : index
    %73 = vector.load %arg2[%c3_64, %c0_65, %c0_66] : memref<9x8x256xf32, #tpu.memory_space<vmem>>, vector<1x8x256xf32>
    %74 = vector.shape_cast %73 : vector<1x8x256xf32> to vector<8x256xf32>
    %75 = arith.mulf %72, %74 : vector<8x256xf32>
    %c24_67 = arith.constant 24 : index
    %c0_68 = arith.constant 0 : index
    %76 = vector.load %arg10[%c24_67, %c0_68] : memref<72x256xf32, #tpu.memory_space<vmem>>, vector<8x256xf32>
    tpu.vector_store %arg10[%c24_67, %c0_68], %75 {strides = array<i32>} : memref<72x256xf32, #tpu.memory_space<vmem>>, vector<8x256xf32>,
    %c32_69 = arith.constant 32 : index
    %c0_70 = arith.constant 0 : index
    %77 = vector.load %arg10[%c32_69, %c0_70] : memref<72x256xf32, #tpu.memory_space<vmem>>, vector<8x256xf32>
    tpu.vector_store %arg10[%c32_69, %c0_70], %52 {strides = array<i32>} : memref<72x256xf32, #tpu.memory_space<vmem>>, vector<8x256xf32>,
    %c255_i32_71 = arith.constant 255 : i32
    %78 = tpu.dynamic_rotate %52 by %c255_i32_71 dim 1 : vector<8x256xf32>, i32 -> vector<8x256xf32>
    %c5_72 = arith.constant 5 : index
    %c0_73 = arith.constant 0 : index
    %c0_74 = arith.constant 0 : index
    %79 = vector.load %arg2[%c5_72, %c0_73, %c0_74] : memref<9x8x256xf32, #tpu.memory_space<vmem>>, vector<1x8x256xf32>
    %80 = vector.shape_cast %79 : vector<1x8x256xf32> to vector<8x256xf32>
    %81 = arith.mulf %78, %80 : vector<8x256xf32>
    %c40_75 = arith.constant 40 : index
    %c0_76 = arith.constant 0 : index
    %82 = vector.load %arg10[%c40_75, %c0_76] : memref<72x256xf32, #tpu.memory_space<vmem>>, vector<8x256xf32>
    tpu.vector_store %arg10[%c40_75, %c0_76], %81 {strides = array<i32>} : memref<72x256xf32, #tpu.memory_space<vmem>>, vector<8x256xf32>,
    %c241_i32_77 = arith.constant 241 : i32
    %83 = tpu.dynamic_rotate %52 by %c241_i32_77 dim 1 : vector<8x256xf32>, i32 -> vector<8x256xf32>
    %c6_78 = arith.constant 6 : index
    %c0_79 = arith.constant 0 : index
    %c0_80 = arith.constant 0 : index
    %84 = vector.load %arg2[%c6_78, %c0_79, %c0_80] : memref<9x8x256xf32, #tpu.memory_space<vmem>>, vector<1x8x256xf32>
    %85 = vector.shape_cast %84 : vector<1x8x256xf32> to vector<8x256xf32>
    %86 = arith.mulf %83, %85 : vector<8x256xf32>
    %c48_81 = arith.constant 48 : index
    %c0_82 = arith.constant 0 : index
    %87 = vector.load %arg10[%c48_81, %c0_82] : memref<72x256xf32, #tpu.memory_space<vmem>>, vector<8x256xf32>
    tpu.vector_store %arg10[%c48_81, %c0_82], %86 {strides = array<i32>} : memref<72x256xf32, #tpu.memory_space<vmem>>, vector<8x256xf32>,
    %c240_i32_83 = arith.constant 240 : i32
    %88 = tpu.dynamic_rotate %52 by %c240_i32_83 dim 1 : vector<8x256xf32>, i32 -> vector<8x256xf32>
    %c7_84 = arith.constant 7 : index
    %c0_85 = arith.constant 0 : index
    %c0_86 = arith.constant 0 : index
    %89 = vector.load %arg2[%c7_84, %c0_85, %c0_86] : memref<9x8x256xf32, #tpu.memory_space<vmem>>, vector<1x8x256xf32>
    %90 = vector.shape_cast %89 : vector<1x8x256xf32> to vector<8x256xf32>
    %91 = arith.mulf %88, %90 : vector<8x256xf32>
    %c56_87 = arith.constant 56 : index
    %c0_88 = arith.constant 0 : index
    %92 = vector.load %arg10[%c56_87, %c0_88] : memref<72x256xf32, #tpu.memory_space<vmem>>, vector<8x256xf32>
    tpu.vector_store %arg10[%c56_87, %c0_88], %91 {strides = array<i32>} : memref<72x256xf32, #tpu.memory_space<vmem>>, vector<8x256xf32>,
    %c239_i32_89 = arith.constant 239 : i32
    %93 = tpu.dynamic_rotate %52 by %c239_i32_89 dim 1 : vector<8x256xf32>, i32 -> vector<8x256xf32>
    %c8_90 = arith.constant 8 : index
    %c0_91 = arith.constant 0 : index
    %c0_92 = arith.constant 0 : index
    %94 = vector.load %arg2[%c8_90, %c0_91, %c0_92] : memref<9x8x256xf32, #tpu.memory_space<vmem>>, vector<1x8x256xf32>
    %95 = vector.shape_cast %94 : vector<1x8x256xf32> to vector<8x256xf32>
    %96 = arith.mulf %93, %95 : vector<8x256xf32>
    %c64_93 = arith.constant 64 : index
    %c0_94 = arith.constant 0 : index
    %97 = vector.load %arg10[%c64_93, %c0_94] : memref<72x256xf32, #tpu.memory_space<vmem>>, vector<8x256xf32>
    tpu.vector_store %arg10[%c64_93, %c0_94], %96 {strides = array<i32>} : memref<72x256xf32, #tpu.memory_space<vmem>>, vector<8x256xf32>,
    %c0_95 = arith.constant 0 : index
    %c0_96 = arith.constant 0 : index
    %98 = vector.load %arg10[%c0_95, %c0_96] : memref<72x256xf32, #tpu.memory_space<vmem>>, vector<72x256xf32>
    %cst_97 = arith.constant dense<0.000000e+00> : vector<8x256xf32>
    %99 = tpu.matmul %54, %98, %cst_97 {dimension_numbers = #tpu.dot_dimension_numbers<[1], [0], [0], [1], [0, 0, 1, 1], [], []>} : vector<8x72xf32>, vector<72x256xf32>, vector<8x256xf32> -> vector<8x256xf32>
    %100 = vector.broadcast %56 : vector<8x1xf32> to vector<8x256xf32>
    %101 = arith.addf %99, %100 : vector<8x256xf32>
    %cst_98 = arith.constant 0.000000e+00 : f32
    %102 = vector.broadcast %cst_98 : f32 to vector<8x256xf32>
    %103 = arith.maximumf %101, %102 : vector<8x256xf32>
    %c0_99 = arith.constant 0 : index
    %c0_100 = arith.constant 0 : index
    %104 = vector.load %arg10[%c0_99, %c0_100] : memref<72x256xf32, #tpu.memory_space<vmem>>, vector<8x256xf32>
    tpu.vector_store %arg10[%c0_99, %c0_100], %1 {strides = array<i32>} : memref<72x256xf32, #tpu.memory_space<vmem>>, vector<8x256xf32>,
    %c8_101 = arith.constant 8 : index
    %c0_102 = arith.constant 0 : index
    %105 = vector.load %arg10[%c8_101, %c0_102] : memref<72x256xf32, #tpu.memory_space<vmem>>, vector<8x256xf32>
    tpu.vector_store %arg10[%c8_101, %c0_102], %52 {strides = array<i32>} : memref<72x256xf32, #tpu.memory_space<vmem>>, vector<8x256xf32>,
    %c16_103 = arith.constant 16 : index
    %c0_104 = arith.constant 0 : index
    %106 = vector.load %arg10[%c16_103, %c0_104] : memref<72x256xf32, #tpu.memory_space<vmem>>, vector<8x256xf32>
    tpu.vector_store %arg10[%c16_103, %c0_104], %103 {strides = array<i32>} : memref<72x256xf32, #tpu.memory_space<vmem>>, vector<8x256xf32>,
    %c0_105 = arith.constant 0 : index
    %c0_106 = arith.constant 0 : index
    %107 = vector.load %arg4[%c0_105, %c0_106] : memref<8x24xf32, #tpu.memory_space<vmem>>, vector<8x24xf32>
    %c0_107 = arith.constant 0 : index
    %c0_108 = arith.constant 0 : index
    %108 = vector.load %arg10[%c0_107, %c0_108] : memref<72x256xf32, #tpu.memory_space<vmem>>, vector<24x256xf32>
    %cst_109 = arith.constant dense<0.000000e+00> : vector<8x256xf32>
    %109 = tpu.matmul %107, %108, %cst_109 {dimension_numbers = #tpu.dot_dimension_numbers<[1], [0], [0], [1], [0, 0, 1, 1], [], []>} : vector<8x24xf32>, vector<24x256xf32>, vector<8x256xf32> -> vector<8x256xf32>
    %c2_110 = arith.constant 2 : index
    %c0_111 = arith.constant 0 : index
    %c0_112 = arith.constant 0 : index
    %110 = vector.load %arg6[%c2_110, %c0_111, %c0_112] : memref<4x8x1xf32, #tpu.memory_space<vmem>>, vector<1x8x1xf32>
    %111 = vector.shape_cast %110 : vector<1x8x1xf32> to vector<8x1xf32>
    %112 = vector.broadcast %111 : vector<8x1xf32> to vector<8x256xf32>
    %113 = arith.addf %109, %112 : vector<8x256xf32>
    %cst_113 = arith.constant 0.000000e+00 : f32
    %114 = vector.broadcast %cst_113 : f32 to vector<8x256xf32>
    %115 = arith.maximumf %113, %114 : vector<8x256xf32>
    %c0_114 = arith.constant 0 : index
    %c0_115 = arith.constant 0 : index
    %116 = vector.load %arg7[%c0_114, %c0_115] : memref<256x1xf32, #tpu.memory_space<vmem>>, vector<256x1xf32>
    %cst_116 = arith.constant dense<0.000000e+00> : vector<8x1xf32>
    %117 = tpu.matmul %115, %116, %cst_116 {dimension_numbers = #tpu.dot_dimension_numbers<[1], [0], [0], [1], [0, 0, 1, 1], [], []>} : vector<8x256xf32>, vector<256x1xf32>, vector<8x1xf32> -> vector<8x1xf32>
    %c0_117 = arith.constant 0 : index
    %c0_118 = arith.constant 0 : index
    %118 = vector.load %arg5[%c0_117, %c0_118] : memref<8x8xf32, #tpu.memory_space<vmem>>, vector<8x8xf32>
    %cst_119 = arith.constant dense<0.000000e+00> : vector<8x1xf32>
    %119 = tpu.matmul %118, %117, %cst_119 {dimension_numbers = #tpu.dot_dimension_numbers<[1], [0], [0], [1], [0, 0, 1, 1], [], []>} : vector<8x8xf32>, vector<8x1xf32>, vector<8x1xf32> -> vector<8x1xf32>
    %c3_120 = arith.constant 3 : index
    %c0_121 = arith.constant 0 : index
    %c0_122 = arith.constant 0 : index
    %120 = vector.load %arg6[%c3_120, %c0_121, %c0_122] : memref<4x8x1xf32, #tpu.memory_space<vmem>>, vector<1x8x1xf32>
    %121 = vector.shape_cast %120 : vector<1x8x1xf32> to vector<8x1xf32>
    %122 = arith.addf %119, %121 : vector<8x1xf32>
    %123 = arith.negf %122 : vector<8x1xf32>
    %124 = math.exp %123 : vector<8x1xf32>
    %cst_123 = arith.constant 1.000000e+00 : f32
    %125 = vector.broadcast %cst_123 : f32 to vector<8x1xf32>
    %126 = arith.addf %125, %124 : vector<8x1xf32>
    %127 = arith.divf %125, %126 : vector<8x1xf32>
    %c0_124 = arith.constant 0 : index
    %c0_125 = arith.constant 0 : index
    %128 = vector.load %arg8[%c0_124, %c0_125] : memref<1x256xf32, #tpu.memory_space<vmem>>, vector<1x256xf32>
    %cst_126 = arith.constant dense<0.000000e+00> : vector<8x256xf32>
    %129 = tpu.matmul %127, %128, %cst_126 {dimension_numbers = #tpu.dot_dimension_numbers<[1], [0], [0], [1], [0, 0, 1, 1], [], []>} : vector<8x1xf32>, vector<1x256xf32>, vector<8x256xf32> -> vector<8x256xf32>
    %130 = arith.mulf %115, %129 : vector<8x256xf32>
    %c0_127 = arith.constant 0 : index
    %c0_128 = arith.constant 0 : index
    %c0_129 = arith.constant 0 : index
    %131 = vector.load %arg9[%c0_127, %c0_128, %c0_129] : memref<1x8x256xf32, #tpu.memory_space<vmem>>, vector<1x8x256xf32>
    %132 = vector.shape_cast %131 : vector<1x8x256xf32> to vector<8x256xf32>
    %133 = vector.shape_cast %130 : vector<8x256xf32> to vector<1x8x256xf32>
    tpu.vector_store %arg9[%c0_127, %c0_128, %c0_129], %133 {strides = array<i32>} : memref<1x8x256xf32, #tpu.memory_space<vmem>>, vector<1x8x256xf32>,
    return
  }
  func.func @transform_0(%arg0: i32) -> (i32, i32, i32) {
    %c0_i32 = arith.constant 0 : i32
    %c0_i32_0 = arith.constant 0 : i32
    %c0_i32_1 = arith.constant 0 : i32
    return %arg0, %c0_i32, %c0_i32_0 : i32, i32, i32
  }
  func.func @transform_1(%arg0: i32) -> (i32, i32, i32) {
    %c0_i32 = arith.constant 0 : i32
    %c0_i32_0 = arith.constant 0 : i32
    %c0_i32_1 = arith.constant 0 : i32
    %c0_i32_2 = arith.constant 0 : i32
    return %c0_i32, %c0_i32_0, %c0_i32_1 : i32, i32, i32
  }
  func.func @transform_2(%arg0: i32) -> (i32, i32, i32) {
    %c0_i32 = arith.constant 0 : i32
    %c0_i32_0 = arith.constant 0 : i32
    %c0_i32_1 = arith.constant 0 : i32
    %c0_i32_2 = arith.constant 0 : i32
    return %c0_i32, %c0_i32_0, %c0_i32_1 : i32, i32, i32
  }
  func.func @transform_3(%arg0: i32) -> (i32, i32) {
    %c0_i32 = arith.constant 0 : i32
    %c0_i32_0 = arith.constant 0 : i32
    %c0_i32_1 = arith.constant 0 : i32
    return %c0_i32, %c0_i32_0 : i32, i32
  }
  func.func @transform_4(%arg0: i32) -> (i32, i32) {
    %c0_i32 = arith.constant 0 : i32
    %c0_i32_0 = arith.constant 0 : i32
    %c0_i32_1 = arith.constant 0 : i32
    return %c0_i32, %c0_i32_0 : i32, i32
  }
  func.func @transform_5(%arg0: i32) -> (i32, i32, i32) {
    %c0_i32 = arith.constant 0 : i32
    %c0_i32_0 = arith.constant 0 : i32
    %c0_i32_1 = arith.constant 0 : i32
    %c0_i32_2 = arith.constant 0 : i32
    return %c0_i32, %c0_i32_0, %c0_i32_1 : i32, i32, i32
  }
  func.func @transform_6(%arg0: i32) -> (i32, i32) {
    %c0_i32 = arith.constant 0 : i32
    %c0_i32_0 = arith.constant 0 : i32
    %c0_i32_1 = arith.constant 0 : i32
    return %c0_i32, %c0_i32_0 : i32, i32
  }
  func.func @transform_7(%arg0: i32) -> (i32, i32) {
    %c0_i32 = arith.constant 0 : i32
    %c0_i32_0 = arith.constant 0 : i32
    %c0_i32_1 = arith.constant 0 : i32
    return %c0_i32, %c0_i32_0 : i32, i32
  }
  func.func @transform_8(%arg0: i32) -> (i32, i32, i32) {
    %c0_i32 = arith.constant 0 : i32
    %c0_i32_0 = arith.constant 0 : i32
    %c0_i32_1 = arith.constant 0 : i32
    return %arg0, %c0_i32, %c0_i32_0 : i32, i32, i32
  }
}

</mosaic_0001>

<bundles_post_ra>
// kernel: tpu_custom_call.1
= control target key start
LH: loop header
LB: loop body
LE: loop exit
PB: predicated region body
PF: predicated region fallthrough
CT: control target
= control target key end

     0   :  { %13 = vsyncpa [#allocation4], 0  ;;  %s1931_s0 = inlined_call_operand.vmem [shape: f32[2,8,256], index: 0, kind: input, shape index: {}]   ;;  %s1932_s1 = inlined_call_operand.vmem [shape: f32[9,8,256], index: 1, kind: input, shape index: {}]   ;;  %s1933_s2 = inlined_call_operand.vmem [shape: f32[2,8,72], index: 2, kind: input, shape index: {}]   ;;  %s1934_s3 = inlined_call_operand.vmem [shape: f32[8,24], index: 3, kind: input, shape index: {}]   ;;  %s1935_s4 = inlined_call_operand.vmem [shape: f32[8,8], index: 4, kind: input, shape index: {}]   ;;  %s1936_s5 = inlined_call_operand.vmem [shape: f32[4,8,1], index: 5, kind: input, shape index: {}]   ;;  %s1937_s6 = inlined_call_operand.vmem [shape: f32[256,1], index: 6, kind: input, shape index: {}]   ;;  %s1938_s7 = inlined_call_operand.vmem [shape: f32[1,256], index: 7, kind: input, shape index: {}]   ;;  %s1939_s8 = inlined_call_operand.hbm [shape: f32[2,8,256], index: 8, kind: output, shape index: {}]  }
   0x1   :  { %15 = vsyncpa [#allocation4 + $0x1], 0  ;;  %s1445_s27 = smov 0   ;;  %s1447_s28 = smov 0  }
   0x2   :  { %s1449_s29 = smov 0   ;;  %s1451_s30 = smov 0  }
   0x3 LB: > { %s1466_s9 = sadd.s32 4294967295, %s1386_s30   ;;  %s1174_s10 = sadd.s32 4294967294, %s1386_s30   ;;  %s1386_s30 = sphi %s1451_s30, %s1948_s30   ;;  %s1382_s29 = sphi %s1449_s29, %s1947_s29   ;;  %s1378_s28 = sphi %s1447_s28, %s1946_s28   ;;  %s1374_s27 = sphi %s1445_s27, %s1945_s27  }
   0x4   : > { %s1470_s11 = sadd.s32 1, %s1386_s30   ;;  %s201_s12 = sadd.s32 1, %s1382_s29 }
   0x5   : > { %s198_s13 = ssub.s32 %s1386_s30, %s1470_s11  ;;  %p211_p0 = scmp.ne.s32.totalorder %s1382_s29, %s1378_s28 }
   0x6   : > { %p199_p1 = scmp.eq.s32.totalorder %s198_s13, 0  ;;  %p212_p2 = scmp.eq.s32.totalorder %s1466_s9, 1 }
   0x7   : > { %p217_p3 = scmp.ne.s32.totalorder %s1378_s28, %s1374_s27  ;;  %p218_p4 = scmp.eq.s32.totalorder %s1174_s10, 1 }
   0x8   : > { %s1481_s14 = scalar_select %p199_p1, %s1382_s29, %s201_s12  }
   0x9   : > { %p1483_p5 = por %p212_p2, %p211_p0  ;;  %p1487_p6 = por %p218_p4, %p217_p3 }
   0xa   : > { %p1177_p7 = scmp.ge.s32.totalorder %s1386_s30, 1  ;;  %p265_p8 = scmp.lt.s32.totalorder %s1386_s30, 3 }
   0xc   : > { %p266_p9 = pnand %p1177_p7, %p265_p8 }
   0xd   : > { %p299_p10 = scmp.lt.s32.totalorder (!%p266_p9), %s1466_s9, 1  ;;  %s1388_s22 = smov (!%p266_p9), 112  }
   0xe   : > { %269 = sbr.rel (%p266_p9) target bundleno = 1561 (0x619), region = 52  ;;  %s1389_s23 = smov (!%p266_p9), 111  }
   0xf   : > { %s1390_s24 = smov (!%p266_p9), 113   ;;  %s1391_s25 = smov (!%p266_p9), 127  }
  0x10   : > { %s1392_s26 = smov (!%p266_p9), 1   ;;  %s1394_s10 = smov (!%p266_p9), 15  }
  0x11   : > { %s1396_s12 = smov (!%p266_p9), 16   ;;  %s1940_s13 = smov (!%p266_p9), 17  }
  0x12   : > { %s1399_s20 = smov (!%p266_p9), [#allocation3]  }
  0x13   : > { %s300_s17 = scalar_select %p299_p10, %s1466_s9, 1  ;;  %v1393_v2 = vmov 0.0   ;;  %v1395_v3 = vmov 0   ;;  %v307_v4 = vld [vmem:[%s1936_s5] sm:$0xff]  ;;  %v312_v5 = vlaneseq  ;;  %v1547_v9 = vld [vmem:[%s1932_s1 + $0x88] sm:$0xff]  ;;  %v1557_v13 = vld [vmem:[%s1932_s1 + $0x78] sm:$0xff] }
  0x14   : > { %514 = vmatprep.mubr.f32.mxu0 %v1393_v2  ;;  %715 = vmatprep.mubr.f32.mxu1 %v1393_v2  ;;  %v1552_v10 = vld [vmem:[%s1932_s1 + $0x80] sm:$0xff]  ;;  %v1568_v17 = vld [vmem:[%s1932_s1 + $0x70] sm:$0xff]  ;;  %v1583_v22 = vld [vmem:[%s1932_s1 + $0x68] sm:$0xff]  ;;  %vm446_vm8 = vcmask 588800   ;;  %vm744_vm9 = vcmask 195584   ;;  %vm1398_vm10 = vmmov 0  }
  0x15   : > { %s1226_s18 = sshll.u32 %s300_s17, 4  ;;  %1320 = vset.pattern.permute.xlu0 %v1395_v3  ;;  %1321 = vset.pattern.permute.xlu1 %v1395_v3  ;;  %v1540_v6 = vand.u32 127, %v312_v5  ;;  %v1578_v21 = vld [vmem:[%s1932_s1 + $0x60] sm:$0xff]  ;;  %v1597_v31 = vld [vmem:[%s1932_s1 + $0x50] sm:$0xff]  ;;  %v1602_v32 = vld [vmem:[%s1932_s1 + $0x58] sm:$0xff]  ;;  %vm926_vm11 = vcmask 64512  }
  0x16   : > { %s303_s21 = scalar_lea.vmem %s1931_s0, %s1226_s18  ;;  %v1614_v39 = vld [vmem:[%s1932_s1 + $0x30] sm:$0xff]  ;;  %v1619_v40 = vld [vmem:[%s1932_s1 + $0x38] sm:$0xff]  ;;  %v1633_v47 = vld [vmem:[%s1932_s1 + $0x20] sm:$0xff]  ;;  %vm1020_vm12 = vcmask 1040384   ;;  %vm1016_vm13 = vcmask 7168  }
  0x17   : > { %v1498_v0 = vld [vmem:[%s303_s21] sm:$0xff]  ;;  %v1504_v1 = vld [vmem:[%s303_s21 + $0x8] sm:$0xff]  ;;  %vm399_vm0 = vcmp.lt.s32.totalorder %v1540_v6, 112  ;;  %vm413_vm1 = vcmp.lt.s32.totalorder %v1540_v6, 111  ;;  %vm385_vm2 = vcmp.lt.s32.totalorder %v1540_v6, 113  ;;  %vm371_vm3 = vcmp.lt.s32.totalorder %v1540_v6, 127 }
  0x18   : > { %395 = vrot.lane.b32.xlu1 %v1498_v0, %s1388_s22  ;;  %409 = vrot.lane.b32.xlu0 %v1498_v0, %s1389_s23  ;;  %vm355_vm4 = vcmp.lt.s32.totalorder %v1540_v6, 1  ;;  %vm341_vm5 = vcmp.lt.s32.totalorder %v1540_v6, 15  ;;  %v1638_v48 = vld [vmem:[%s1932_s1 + $0x28] sm:$0xff]  ;;  %vm327_vm6 = vcmp.lt.s32.totalorder %v1540_v6, 16  ;;  %v1650_v55 = vld [vmem:[%s1932_s1 + $0x10] sm:$0xff]  ;;  %vm314_vm7 = vcmp.lt.s32.totalorder %v1540_v6, 17 }
  0x19   : > { %v1655_v56 = vld [vmem:[%s1932_s1 + $0x18] sm:$0xff]  ;;  %v1667_v63 = vld [vmem:[%s1932_s1] sm:$0xff]  ;;  %v1672_v3 = vld [vmem:[%s1932_s1 + $0x8] sm:$0xff] }
  0x1a   : > { %v852_v6 = vld [vmem:[%s1937_s6 + $0xf8] sm:$0xff] }
  0x1c   : > { %397 = vrot.lane.b32.xlu1 %v1504_v1, %s1388_s22  ;;  %411 = vrot.lane.b32.xlu0 %v1504_v1, %s1389_s23 }
  0x20   : > { %383 = vrot.lane.b32.xlu1 %v1504_v1, %s1390_s24  ;;  %381 = vrot.lane.b32.xlu0 %v1498_v0, %s1390_s24 }
  0x24   : > { %369 = vrot.lane.b32.xlu1 %v1504_v1, %s1391_s25  ;;  %367 = vrot.lane.b32.xlu0 %v1498_v0, %s1391_s25 }
  0x28   : > { %353 = vrot.lane.b32.xlu1 %v1504_v1, %s1392_s26  ;;  %351 = vrot.lane.b32.xlu0 %v1498_v0, %s1392_s26 }
  0x2c   : > { %339 = vrot.lane.b32.xlu1 %v1504_v1, %s1394_s10  ;;  %337 = vrot.lane.b32.xlu0 %v1498_v0, %s1394_s10 }
  0x30   : > { %325 = vrot.lane.b32.xlu1 %v1504_v1, %s1396_s12  ;;  %323 = vrot.lane.b32.xlu0 %v1498_v0, %s1396_s12 }
  0x34   : > { %310 = vrot.lane.b32.xlu1 %v1504_v1, %s1940_s13  ;;  %308 = vrot.lane.b32.xlu0 %v1498_v0, %s1940_s13 }
  0x38   : > { %443 = vperm.xlu0 %1320, %v307_v4  }
  0x8a   : > { %v396_v7 = vpop.permute.xlu1 %395  ;;  %v410_v8 = vpop.permute.xlu0 %409 }
  0x8e   : > { %v398_v11 = vpop.permute.xlu1 %397  ;;  %v412_v12 = vpop.permute.xlu0 %411 }
  0x8f   : > { %v401_v14 = vsel %vm399_vm0, %v398_v11, %v396_v7  ;;  %v414_v15 = vsel %vm413_vm1, %v410_v8, %v412_v12  ;;  %v415_v16 = vsel %vm413_vm1, %v412_v12, %v410_v8  ;;  %v400_v18 = vsel %vm399_vm0, %v396_v7, %v398_v11 }
  0x90   : > { %v420_v19 = vmul.f32 %v1547_v9, %v415_v16  ;;  %v419_v20 = vmul.f32 %v1552_v10, %v414_v15  ;;  %v406_v23 = vmul.f32 %v1557_v13, %v401_v14  ;;  %v405_v26 = vmul.f32 %v1568_v17, %v400_v18  ;;  %v306_v15 = vld [vmem:[%s1933_s2] sm:$0xff] }
  0x92   : > { %v384_v24 = vpop.permute.xlu1 %383  ;;  %464 = vmatprep.subr.mxu0 %v420_v19  ;;  %v382_v25 = vpop.permute.xlu0 %381 }
  0x93   : > { %v386_v27 = vsel %vm385_vm2, %v382_v25, %v384_v24  ;;  %v387_v28 = vsel %vm385_vm2, %v384_v24, %v382_v25  ;;  %465 = vmatpush1.msra.mxu0 %v419_v20 }
  0x94   : > { %v391_v29 = vmul.f32 %v1578_v21, %v386_v27  ;;  %v392_v30 = vmul.f32 %v1583_v22, %v387_v28  ;;  %466 = vmatprep.subr.mxu0 %v406_v23 }
  0x95   : > { %467 = vmatpush1.msra.mxu0 %v405_v26  ;;  %v1197_v26 = vld [vmem:[%s1936_s5 + $0x8] sm:$0xff] }
  0x96   : > { %v370_v33 = vpop.permute.xlu1 %369  ;;  %468 = vmatprep.subr.mxu0 %v392_v30  ;;  %v368_v34 = vpop.permute.xlu0 %367 }
  0x97   : > { %v372_v35 = vsel %vm371_vm3, %v368_v34, %v370_v33  ;;  %v373_v36 = vsel %vm371_vm3, %v370_v33, %v368_v34  ;;  %469 = vmatpush1.msra.mxu0 %v391_v29 }
  0x98   : > { %v377_v37 = vmul.f32 %v1597_v31, %v372_v35  ;;  %v378_v38 = vmul.f32 %v1602_v32, %v373_v36 }
  0x9a   : > { %v354_v41 = vpop.permute.xlu1 %353  ;;  %470 = vmatprep.subr.mxu0 %v378_v38  ;;  %v352_v42 = vpop.permute.xlu0 %351 }
  0x9b   : > { %v356_v43 = vsel %vm355_vm4, %v352_v42, %v354_v41  ;;  %v357_v44 = vsel %vm355_vm4, %v354_v41, %v352_v42  ;;  %471 = vmatpush1.msra.mxu0 %v377_v37 }
  0x9c   : > { %v361_v45 = vmul.f32 %v1614_v39, %v357_v44  ;;  %v362_v46 = vmul.f32 %v1619_v40, %v356_v43  ;;  %472 = vmatprep.subr.mxu0 %v1504_v1 }
  0x9d   : > { %473 = vmatpush1.msra.mxu0 %v1498_v0 }
  0x9e   : > { %v340_v49 = vpop.permute.xlu1 %339  ;;  %474 = vmatprep.subr.mxu0 %v362_v46  ;;  %v338_v50 = vpop.permute.xlu0 %337 }
  0x9f   : > { %v342_v51 = vsel %vm341_vm5, %v338_v50, %v340_v49  ;;  %v343_v52 = vsel %vm341_vm5, %v340_v49, %v338_v50  ;;  %475 = vmatpush1.msra.mxu0 %v361_v45 }
  0xa0   : > { %v347_v53 = vmul.f32 %v1633_v47, %v343_v52  ;;  %v348_v54 = vmul.f32 %v1638_v48, %v342_v51 }
  0xa2   : > { %v326_v57 = vpop.permute.xlu1 %325  ;;  %476 = vmatprep.subr.mxu0 %v348_v54  ;;  %v324_v58 = vpop.permute.xlu0 %323 }
  0xa3   : > { %v328_v59 = vsel %vm327_vm6, %v324_v58, %v326_v57  ;;  %v329_v60 = vsel %vm327_vm6, %v326_v57, %v324_v58  ;;  %477 = vmatpush1.msra.mxu0 %v347_v53 }
  0xa4   : > { %v333_v61 = vmul.f32 %v1650_v55, %v329_v60  ;;  %v334_v62 = vmul.f32 %v1655_v56, %v328_v59 }
  0xa6   : > { %v311_v4 = vpop.permute.xlu1 %310  ;;  %478 = vmatprep.subr.mxu0 %v334_v62  ;;  %v309_v7 = vpop.permute.xlu0 %308 }
  0xa7   : > { %v315_v8 = vsel %vm314_vm7, %v309_v7, %v311_v4  ;;  %v316_v11 = vsel %vm314_vm7, %v311_v4, %v309_v7  ;;  %479 = vmatpush1.msra.mxu0 %v333_v61 }
  0xa8   : > { %v319_v12 = vmul.f32 %v1667_v63, %v316_v11  ;;  %v320_v14 = vmul.f32 %v1672_v3, %v315_v8 }
  0xaa   : > { %480 = vmatprep.subr.mxu0 %v320_v14 }
  0xab   : > { %481 = vmatpush1.msra.mxu0 %v319_v12 }
  0xac   : > { %1195 = vmatmul.mubr.msk.f32.vlgmr.msra.gmra.mxu0 %vm446_vm8, %v306_v15 }
  0xad   : > { %812 = vmatprep.mubr.f32.mxu0 %v1393_v2 }
  0xb3   : > { %v444_v16 = vpop.permute.xlu0 %443 }
 0x16c   : > { %v516_v18 = vpop.f32.mrf.mxu0 }
 0x16d   : > { %v517_v19 = vadd.f32 %v516_v18, %v444_v16  ;;  %v835_v18 = vld [vmem:[%s1937_s6 + $0x70] sm:$0xff] }
 0x16e   : > { %v518_v20 = vpop.f32.mrf.mxu0 }
 0x16f   : > { %v1685_v23 = vmax.f32 %v517_v19, 0.0  ;;  %v519_v24 = vadd.f32 %v518_v20, %v444_v16  ;;  %v850_v19 = vld [vmem:[%s1937_s6 + $0xe8] sm:$0xff] }
 0x170   : > { %v834_v20 = vld [vmem:[%s1937_s6 + $0x68] sm:$0xff] }
 0x171   : > { %601 = vrot.lane.b32.xlu0 %v1685_v23, %s1388_s22  ;;  %613 = vrot.lane.b32.xlu1 %v1685_v23, %s1389_s23  ;;  %v1691_v25 = vmax.f32 %v519_v24, 0.0  ;;  %v849_v24 = vld [vmem:[%s1937_s6 + $0xe0] sm:$0xff] }
 0x175   : > { %589 = vrot.lane.b32.xlu0 %v1685_v23, %s1390_s24  ;;  %615 = vrot.lane.b32.xlu1 %v1691_v25, %s1389_s23  ;;  %s1944_s23 = smov 17  }
 0x179   : > { %577 = vrot.lane.b32.xlu0 %v1685_v23, %s1391_s25  ;;  %603 = vrot.lane.b32.xlu1 %v1691_v25, %s1388_s22  ;;  %s296_s22 = sand.u32 1, %s1378_s28  }
 0x17a   : > { %s1101_s19 = scalar_lea.sflag [#allocation4], %s296_s22 }
 0x17d   : > { %563 = vrot.lane.b32.xlu0 %v1685_v23, %s1392_s26  ;;  %591 = vrot.lane.b32.xlu1 %v1691_v25, %s1390_s24  ;;  %s1178_s24 = sshll.u32 %s296_s22, 4 }
 0x181   : > { %551 = vrot.lane.b32.xlu0 %v1685_v23, %s1394_s10  ;;  %579 = vrot.lane.b32.xlu1 %v1691_v25, %s1391_s25  ;;  %s1227_s25 = sshll.u32 %s1466_s9, 8  ;;  %s1330_s9 = sshll.u32 %s1399_s20, 4  ;;  %s1331_s9 = int_to_ptr.vmem [resolvable:$false] %s1330_s9 }
 0x182   : > { %s1113_s18 = scalar_lea.hbm %s1939_s8, %s1227_s25  ;;  %s1332_s21 = scalar_lea.vmem %s1331_s9, 512 }
 0x185   : > { %539 = vrot.lane.b32.xlu0 %v1685_v23, %s1396_s12  ;;  %565 = vrot.lane.b32.xlu1 %v1691_v25, %s1392_s26  ;;  %s298_s26 = scalar_lea.vmem [#allocation3], %s1178_s24 }
 0x189   : > { %527 = vrot.lane.b32.xlu0 %v1685_v23, %s1944_s23  ;;  %553 = vrot.lane.b32.xlu1 %v1691_v25, %s1394_s10  ;;  %s1115_s10 = sshll.u32 %s298_s26, 4  ;;  %s1116_s10 = int_to_ptr.vmem [resolvable:$true] %s1115_s10 }
 0x18a   : > { %s1326_s13 = scalar_lea.vmem %s1116_s10, 256  ;;  %p1333_p0 = scmp.lt.s32.totalorder %s1116_s10, %s1331_s9 }
 0x18b   : > { %p1327_p11 = scmp.ne.s32.totalorder %s1116_s10, %s1326_s13  ;;  %p1334_p1 = scmp.lt.s32.totalorder %s1332_s21, %s1326_s13 }
 0x18d   : > { %645 = vperm.xlu0 %1320, %v1197_v26   ;;  %541 = vrot.lane.b32.xlu1 %v1691_v25, %s1396_s12  ;;  %v833_v26 = vld [vmem:[%s1937_s6 + $0x60] sm:$0xff]  ;;  %p1328_p12 = pnand %p1327_p11, %p1483_p5  ;;  %p1335_p2 = por %p1334_p1, %p1333_p0 }
 0x18f   : > { %p1329_p13 = pneg %p1328_p12 }
 0x191   : > { %529 = vrot.lane.b32.xlu1 %v1691_v25, %s1944_s23  ;;  %p1336_p3 = pnand %p1335_p2, %p1329_p13 }
 0x1e3   : > { %v602_v27 = vpop.permute.xlu0 %601  ;;  %v614_v28 = vpop.permute.xlu1 %613 }
 0x1e7   : > { %v590_v29 = vpop.permute.xlu0 %589  ;;  %v616_v30 = vpop.permute.xlu1 %615 }
 0x1e8   : > { %v617_v33 = vsel %vm413_vm1, %v614_v28, %v616_v30  ;;  %v618_v34 = vsel %vm413_vm1, %v616_v30, %v614_v28  ;;  %v832_v28 = vld [vmem:[%s1937_s6 + $0x58] sm:$0xff]  ;;  %v831_v30 = vld [vmem:[%s1937_s6 + $0x50] sm:$0xff] }
 0x1e9   : > { %v622_v35 = vmul.f32 %v1547_v9, %v618_v34  ;;  %v621_v36 = vmul.f32 %v1552_v10, %v617_v33  ;;  %v846_v33 = vld [vmem:[%s1937_s6 + $0xc8] sm:$0xff] }
 0x1ea   : > { %v830_v34 = vld [vmem:[%s1937_s6 + $0x48] sm:$0xff] }
 0x1eb   : > { %v578_v37 = vpop.permute.xlu0 %577  ;;  %665 = vmatprep.subr.mxu1 %v622_v35  ;;  %v604_v38 = vpop.permute.xlu1 %603  ;;  %v845_v35 = vld [vmem:[%s1937_s6 + $0xc0] sm:$0xff] }
 0x1ec   : > { %v605_v41 = vsel %vm399_vm0, %v602_v27, %v604_v38  ;;  %v606_v42 = vsel %vm399_vm0, %v604_v38, %v602_v27  ;;  %666 = vmatpush1.msra.mxu1 %v621_v36  ;;  %v848_v27 = vld [vmem:[%s1937_s6 + $0xd8] sm:$0xff]  ;;  %v829_v36 = vld [vmem:[%s1937_s6 + $0x40] sm:$0xff] }
 0x1ed   : > { %v609_v43 = vmul.f32 %v1568_v17, %v605_v41  ;;  %v610_v44 = vmul.f32 %v1557_v13, %v606_v42  ;;  %v828_v38 = vld [vmem:[%s1937_s6 + $0x38] sm:$0xff]  ;;  %v843_v41 = vld [vmem:[%s1937_s6 + $0xb0] sm:$0xff] }
 0x1ee   : > { %v827_v42 = vld [vmem:[%s1937_s6 + $0x30] sm:$0xff] }
 0x1ef   : > { %667 = vmatprep.subr.mxu1 %v610_v44  ;;  %v592_v45 = vpop.permute.xlu1 %591  ;;  %v564_v46 = vpop.permute.xlu0 %563  ;;  %v826_v44 = vld [vmem:[%s1937_s6 + $0x28] sm:$0xff] }
 0x1f0   : > { %v593_v9 = vsel %vm385_vm2, %v590_v29, %v592_v45  ;;  %v594_v10 = vsel %vm385_vm2, %v592_v45, %v590_v29  ;;  %668 = vmatpush1.msra.mxu1 %v609_v43  ;;  %v847_v29 = vld [vmem:[%s1937_s6 + $0xd0] sm:$0xff]  ;;  %v842_v43 = vld [vmem:[%s1937_s6 + $0xa8] sm:$0xff]  ;;  %v841_v45 = vld [vmem:[%s1937_s6 + $0xa0] sm:$0xff] }
 0x1f1   : > { %v597_v49 = vmul.f32 %v1578_v21, %v593_v9  ;;  %v598_v50 = vmul.f32 %v1583_v22, %v594_v10  ;;  %v825_v9 = vld [vmem:[%s1937_s6 + $0x20] sm:$0xff] }
 0x1f3   : > { %669 = vmatprep.subr.mxu1 %v598_v50  ;;  %v580_v51 = vpop.permute.xlu1 %579  ;;  %v552_v54 = vpop.permute.xlu0 %551 }
 0x1f4   : > { %v581_v17 = vsel %vm371_vm3, %v578_v37, %v580_v51  ;;  %v582_v13 = vsel %vm371_vm3, %v580_v51, %v578_v37  ;;  %670 = vmatpush1.msra.mxu1 %v597_v49  ;;  %v844_v37 = vld [vmem:[%s1937_s6 + $0xb8] sm:$0xff] }
 0x1f5   : > { %v585_v52 = vmul.f32 %v1597_v31, %v581_v17  ;;  %v586_v53 = vmul.f32 %v1602_v32, %v582_v13 }
 0x1f7   : > { %671 = vmatprep.subr.mxu1 %v586_v53  ;;  %v566_v57 = vpop.permute.xlu1 %565  ;;  %v540_v61 = vpop.permute.xlu0 %539  ;;  %v840_v53 = vld [vmem:[%s1937_s6 + $0x98] sm:$0xff] }
 0x1f8   : > { %v567_v21 = vsel %vm355_vm4, %v564_v46, %v566_v57  ;;  %v568_v22 = vsel %vm355_vm4, %v566_v57, %v564_v46  ;;  %672 = vmatpush1.msra.mxu1 %v585_v52  ;;  %v730_v52 = vld [vmem:[%s1934_s3] sm:$0xff] }
 0x1f9   : > { %v571_v58 = vmul.f32 %v1614_v39, %v568_v22  ;;  %v572_v59 = vmul.f32 %v1619_v40, %v567_v21  ;;  %673 = vmatprep.subr.mxu1 %v1691_v25  ;;  %v837_v57 = vld [vmem:[%s1937_s6 + $0x80] sm:$0xff] }
 0x1fa   : > { %674 = vmatpush1.msra.mxu1 %v1685_v23  ;;  %v821_v21 = vld [vmem:[%s1937_s6] sm:$0xff] }
 0x1fb   : > { %675 = vmatprep.subr.mxu1 %v572_v59  ;;  %v554_v31 = vpop.permute.xlu1 %553  ;;  %v528_v12 = vpop.permute.xlu0 %527 }
 0x1fc   : > { %v555_v32 = vsel %vm341_vm5, %v552_v54, %v554_v31  ;;  %v556_v60 = vsel %vm341_vm5, %v554_v31, %v552_v54  ;;  %676 = vmatpush1.msra.mxu1 %v571_v58  ;;  %v822_v54 = vld [vmem:[%s1937_s6 + $0x8] sm:$0xff] }
 0x1fd   : > { %v559_v62 = vmul.f32 %v1633_v47, %v556_v60  ;;  %v560_v39 = vmul.f32 %v1638_v48, %v555_v32 }
 0x1ff   : > { %677 = vmatprep.subr.mxu1 %v560_v39  ;;  %v542_v40 = vpop.permute.xlu1 %541 }
 0x200   : > { %v543_v4 = vsel %vm327_vm6, %v540_v61, %v542_v40  ;;  %v544_v7 = vsel %vm327_vm6, %v542_v40, %v540_v61  ;;  %678 = vmatpush1.msra.mxu1 %v559_v62 }
 0x201   : > { %v547_v8 = vmul.f32 %v1650_v55, %v544_v7  ;;  %v548_v11 = vmul.f32 %v1655_v56, %v543_v4  ;;  %v1196_v55 = vld [vmem:[%s1933_s2 + $0x8] sm:$0xff]  ;;  %v1213_v56 = vld [vmem:[%s1936_s5 + $0x10] sm:$0xff]  ;;  %v923_v4 = vld [vmem:[%s1935_s4] sm:$0xff]  ;;  %v1009_v7 = vshrl.u32 %v312_v5, 7 }
 0x202   : > { %741 = vperm.xlu1 %1321, %v1213_v56  }
 0x203   : > { %679 = vmatprep.subr.mxu1 %v548_v11  ;;  %v530_v14 = vpop.permute.xlu1 %529  ;;  %v1010_v11 = vsub.s32 0, %v1009_v7 }
 0x204   : > { %v531_v47 = vsel %vm314_vm7, %v528_v12, %v530_v14  ;;  %v532_v48 = vsel %vm314_vm7, %v530_v14, %v528_v12  ;;  %680 = vmatpush1.msra.mxu1 %v547_v8  ;;  %v1006_v8 = vld [vmem:[%s1938_s7] sm:$0x3]  ;;  %v1014_v12 = vsub.s32 1, %v1009_v7 }
 0x205   : > { %v535_v15 = vmul.f32 %v532_v48, %v1667_v63  ;;  %v536_v16 = vmul.f32 %v531_v47, %v1672_v3  ;;  %v836_v63 = vld [vmem:[%s1937_s6 + $0x78] sm:$0xff]  ;;  %v851_v3 = vld [vmem:[%s1937_s6 + $0xf0] sm:$0xff]  ;;  %v1011_v14 = vrot.slane %v1006_v8, %v1010_v11 }
 0x206   : > { %v1015_v47 = vrot.slane %v1006_v8, %v1014_v12  ;;  %v1215_v48 = vld [vmem:[%s1936_s5 + $0x18] sm:$0xff] }
 0x207   : > { %681 = vmatprep.subr.mxu1 %v536_v16 }
 0x208   : > { %682 = vmatpush1.msra.mxu1 %v535_v15  ;;  %v646_v46 = vpop.permute.xlu0 %645 }
 0x209   : > { %1212 = vmatmul.mubr.msk.f32.vlgmr.msra.gmra.mxu1 %vm446_vm8, %v1196_v55  ;;  %1228 = vmatprep.subr.mxu1 %v852_v6 }
 0x20a   : > { %1229 = vmatpush3.msra.mxu1 %v836_v63 }
 0x20b   : > { %1230 = vmatprep.subr.mxu1 %v851_v3 }
 0x20c   : > { %1231 = vmatpush3.msra.mxu1 %v835_v18 }
 0x20d   : > { %1232 = vmatprep.subr.mxu1 %v850_v19 }
 0x20e   : > { %1233 = vmatpush3.msra.mxu1 %v834_v20 }
 0x20f   : > { %1234 = vmatprep.subr.mxu1 %v849_v24 }
 0x210   : > { %1235 = vmatpush3.msra.mxu1 %v833_v26 }
 0x211   : > { %1236 = vmatprep.subr.mxu1 %v848_v27 }
 0x212   : > { %1237 = vmatpush3.msra.mxu1 %v832_v28 }
 0x213   : > { %1238 = vmatprep.subr.mxu1 %v847_v29 }
 0x214   : > { %1239 = vmatpush3.msra.mxu1 %v831_v30 }
 0x215   : > { %1240 = vmatprep.subr.mxu1 %v846_v33 }
 0x216   : > { %1241 = vmatpush3.msra.mxu1 %v830_v34 }
 0x217   : > { %1242 = vmatprep.subr.mxu1 %v845_v35 }
 0x218   : > { %1243 = vmatpush3.msra.mxu1 %v829_v36 }
 0x219   : > { %1244 = vmatprep.subr.mxu1 %v844_v37 }
 0x21a   : > { %1245 = vmatpush3.msra.mxu1 %v828_v38 }
 0x21b   : > { %1246 = vmatprep.subr.mxu1 %v843_v41 }
 0x21c   : > { %1247 = vmatpush3.msra.mxu1 %v827_v42 }
 0x21d   : > { %1248 = vmatprep.subr.mxu1 %v842_v43 }
 0x21e   : > { %1249 = vmatpush3.msra.mxu1 %v826_v44 }
 0x21f   : > { %1250 = vmatprep.subr.mxu1 %v841_v45 }
 0x220   : > { %1251 = vmatpush3.msra.mxu1 %v825_v9 }
 0x221   : > { %1252 = vmatprep.subr.mxu1 %v840_v53 }
 0x27d   : > { %v742_v22 = vpop.permute.xlu1 %741 }
 0x2c9   : > { %v717_v10 = vpop.f32.mrf.mxu1 }
 0x2ca   : > { %v718_v49 = vadd.f32 %v717_v10, %v646_v46 }
 0x2cb   : > { %v719_v50 = vpop.f32.mrf.mxu1 }
 0x2cc   : > { %v720_v51 = vadd.f32 %v719_v50, %v646_v46  ;;  %v722_v13 = vmax.f32 %v718_v49, 0.0 }
 0x2ce   : > { %v723_v17 = vmax.f32 %v720_v51, 0.0 }
 0x2d0   : > { %774 = vmatprep.subr.mxu0 %v723_v17 }
 0x2d1   : > { %775 = vmatpush1.msra.mxu0 %v722_v13 }
 0x2d2   : > { %776 = vmatprep.subr.mxu0 %v1691_v25  ;;  %v839_v25 = vld [vmem:[%s1937_s6 + $0x90] sm:$0xff] }
 0x2d3   : > { %777 = vmatpush1.msra.mxu0 %v1685_v23  ;;  %v824_v23 = vld [vmem:[%s1937_s6 + $0x18] sm:$0xff] }
 0x2d4   : > { %778 = vmatprep.subr.mxu0 %v1504_v1  ;;  %1253 = vmatpush3.msra.mxu1 %v824_v23  ;;  %v838_v1 = vld [vmem:[%s1937_s6 + $0x88] sm:$0xff] }
 0x2d5   : > { %779 = vmatpush1.msra.mxu0 %v1498_v0  ;;  %1254 = vmatprep.subr.mxu1 %v839_v25  ;;  %v823_v0 = vld [vmem:[%s1937_s6 + $0x10] sm:$0xff] }
 0x2d6   : > { %1214 = vmatmul.mubr.msk.f32.vlgmr.msra.gmra.mxu0 %vm744_vm9, %v730_v52  ;;  %1265 = vmatprep.subr.mxu0 %v1393_v2 }
 0x2d7   : > { %1255 = vmatpush3.msra.mxu1 %v823_v0  ;;  %1267 = vmatprep.mubr.msk.f32.mxu0 %vm1398_vm10, %v1393_v2 }
 0x2d8   : > { %1256 = vmatprep.subr.mxu1 %v838_v1 }
 0x2d9   : > { %1257 = vmatpush3.msra.mxu1 %v822_v54 }
 0x2da   : > { %1258 = vmatprep.subr.mxu1 %v837_v57 }
 0x2db   : > { %1259 = vmatpush3.msra.mxu1 %v821_v21 }
 0x396   : > { %v814_v58 = vpop.f32.mrf.mxu0 }
 0x397   : > { %v815_v59 = vadd.f32 %v814_v58, %v742_v22 }
 0x398   : > { %v816_v31 = vpop.f32.mrf.mxu0 }
 0x399   : > { %v817_v32 = vadd.f32 %v816_v31, %v742_v22  ;;  %v819_v61 = vmax.f32 %v815_v59, 0.0 }
 0x39b   : > { %v820_v60 = vmax.f32 %v817_v32, 0.0 }
 0x39d   : > { %917 = vmatprep.mubr.f32.mxu1 %v820_v60 }
 0x39e   : > { %918 = vmatmul.mubr.f32.vlgmr.msra.gmra.mxu1 %v819_v61 }
 0x45e   : > { %v1260_v62 = vpop.f32.mrf.mxu1 }
 0x460   : > { %v1261_v39 = vpop.f32.mrf.mxu1 }
 0x461   : > { %v1262_v40 = vadd.f32 %v1261_v39, %v1260_v62 }
 0x463   : > { %1266 = vmatpush3.msra.mxu0 %v1262_v40 }
 0x464   : > { %1268 = vmatmul.mubr.msk.f32.vlgmr.msra.gmra.mxu0 %vm926_vm11, %v923_v4  ;;  %1218 = vmatprep.subr.msk.mxu0 %vm1020_vm12, %v1015_v47 }
 0x465   : > { %1089 = vmatprep.mubr.f32.mxu0 %v1393_v2  ;;  %1219 = vmatpush1.msk.msra.mxu0 %vm1020_vm12, %v1011_v14 }
 0x524   : > { %v996_v2 = vpop.f32.mrf.mxu0 }
 0x525   : > { %v997_v15 = vadd.f32 %v1215_v48, %v996_v2 }
 0x526   : > { %v1269_v5 = vpop.f32.mrf.mxu0 }
 0x527   : > { %v1217_v16 = vmul.f32 -1.442695, %v997_v15 }
 0x529   : > { %1322 = vpow2.f32 %v1217_v16 }
 0x536   : > { %v1323_v55 = vpop.eup %1322 }
 0x537   : > { %v1003_v56 = vadd.f32 1.0, %v1323_v55 }
 0x539   : > { %1324 = vrcp.f32 %v1003_v56 }
 0x546   : > { %v1325_v6 = vpop.eup %1324 }
 0x547   : > { %1220 = vmatmul.mubr.msk.f32.vlgmr.msra.gmra.mxu0 %vm1016_vm13, %v1325_v6 }
 0x607   : > { %v1091_v63 = vpop.f32.mrf.mxu0 }
 0x608   : > { %v1096_v3 = vmul.f32 %v1091_v63, %v819_v61 }
 0x609   : > { %v1093_v18 = vpop.f32.mrf.mxu0 }
 0x60a   : > { %1098 = vst [vmem:[%s298_s26] sm:$0xff] %v1096_v3  ;;  %v1097_v19 = vmul.f32 %v1093_v18, %v820_v60 }
 0x60c   : > { %1099 = vst [vmem:[%s298_s26 + $0x8] sm:$0xff] %v1097_v19 }
 0x60d   : > { %1339 = shalt.err (!%p1336_p3)
}
 0x60e   : > { %s1340_s23 = scalar_lea.hbm %s1113_s18, 256  ;;  %s1344_s25 = scalar_lea.hbm %s1939_s8, 512 }
 0x60f   : > { %p1341_p4 = scmp.ne.s32.totalorder %s1113_s18, %s1340_s23  ;;  %p1345_p9 = scmp.lt.s32.totalorder %s1113_s18, %s1939_s8 }
 0x610   : > { %p1346_p10 = scmp.lt.s32.totalorder %s1344_s25, %s1340_s23 }
 0x611   : > { %p1342_p7 = pnand %p1341_p4, %p1483_p5 }
 0x612   : > { %p1347_p11 = por %p1346_p10, %p1345_p9 }
 0x613   : > { %p1343_p8 = pneg %p1342_p7 }
 0x615   : > { %p1348_p12 = pnand %p1347_p11, %p1343_p8 }
 0x617   : > { %1351 = shalt.err (!%p1348_p12)
}
 0x618   : > { %1270 = dma.vmem_to_hbm [thread:$0]  (%p1483_p5), %s1116_s10, 256, %s1113_s18, %s1101_s19  }
 0x619 PF: > { %p1276_p13 = scmp.ge.s32.totalorder %s1386_s30, 2  ;;  %s1127_s17 = sand.u32 1, %s1374_s27  }
 0x61a   : > { %s1128_s13 = scalar_lea.sflag [#allocation4], %s1127_s17 }
 0x61b   : > { %p1273_p0 = pnand %p1276_p13, %p1487_p6 }
 0x61d   : > { %p1274_p1 = pneg %p1273_p0 }
 0x61f   : > { %1369 = dma.done.wait (%p1274_p1), %s1128_s13, 256  }
 0x620   : > { %1371 = vsyncadd (%p1274_p1), %s1128_s13, 4294967040  ;;  %p18_p2 = scmp.ge.s32.totalorder %s1470_s11, 4   ;;  %s1945_s27 = smov %s1378_s28 }
 0x621   : > { %s1946_s28 = smov %s1382_s29  ;;  %s1947_s29 = smov %s1481_s14 }
 0x622   : > { %s1948_s30 = smov %s1470_s11  ;;  %20 = sbr.rel (!%p18_p2) target bundleno = 3 (0x3), region = 98 }
 0x627   :  { %1133 = vsyncpa [#allocation4], 1 }
 0x628   :  { %1135 = vsyncpa [#allocation4 + $0x1], 1 }

</bundles_post_ra>
